<compile_context>
chip_gen: v7x
topology: tpu7x:2x2x1
jax: 0.10.0
libtpu: 0.0.40
codegen_flags: <defaults>
</compile_context>

<pallas_src>
import jax
import jax.numpy as jnp
from jax import lax
from jax.experimental import pallas as pl
from jax.experimental.pallas import tpu as pltpu


# ----------------------------------------------------------------------------
# Fused kernel: the whole Net forward, whole batch, in one invocation (5 dots).
# ----------------------------------------------------------------------------
def _net_fused_kernel(x_ref, wconv_ref, wfc_ref, bias_ref, o_ref):
    def dot(a, b):
        return jnp.dot(a.astype(jnp.bfloat16), b,
                       preferred_element_type=jnp.float32)

    x = x_ref[...]                      # (Npad, 48)  f32, im2col'd padded input
    w1 = wconv_ref[0:48, :]             # (48, 256)   bf16: conv1+pool folded
    w2 = wconv_ref[48:304, :]           # (256, 256)  bf16: conv2+pool folded
    wf1 = wfc_ref[0:256, :]             # (256, 128)  bf16
    wf2 = wfc_ref[256:384, :]           # (128, 128)  bf16
    wf3 = wfc_ref[384:512, :]           # (128, 128)  bf16
    b = bias_ref[...]                   # (8, 128)    f32 (rows 0..2 used)

    h1 = jnp.maximum(dot(x, w1), 0.0)               # conv1 + pool + relu (lanes 0..239)
    h2 = jnp.maximum(dot(h1, w2), 0.0)              # conv2 + pool + relu (lanes 0..159)
    h3 = jnp.maximum(dot(h2, wf1) + b[0:1], 0.0)    # fc1 + relu          (lanes 0..99)
    h4 = jnp.maximum(dot(h3, wf2) + b[1:2], 0.0)    # fc2 + relu          (lanes 0..49)
    o_ref[...] = dot(h4, wf3) + b[2:3]              # fc3                 (lanes 0..1)


# ----------------------------------------------------------------------------
# Wrapper
# ----------------------------------------------------------------------------
def _prep_input(x):
    """(N, 3, 1, 12) NCHW -> (Npad, 48): width-padded input, row-major
    (width-position, channel) flattening, batch padded to a multiple of 8."""
    n = x.shape[0]
    npad = ((n + 7) // 8) * 8
    xw = jnp.transpose(x[:, :, 0, :], (0, 2, 1))      # (N, 12, 3)
    xw = jnp.pad(xw, ((0, 0), (1, 1), (0, 0)))        # (N, 14, 3)  conv width pad
    xf = xw.reshape(n, 42)                            # row r = p*3 + cin
    return jnp.pad(xf, ((0, npad - n), (0, 48 - 42))) # (Npad, 48)


def net_forward(x, params):
    assert x.shape[1:] == (3, 1, 12), x.shape   # fc1(160) fixes the geometry
    n = x.shape[0]
    xf = _prep_input(x)
    npad = xf.shape[0]
    vmem = pltpu.MemorySpace.VMEM

    out = pl.pallas_call(
        _net_fused_kernel,
        out_shape=jax.ShapeDtypeStruct((npad, 128), jnp.float32),
        in_specs=[pl.BlockSpec(memory_space=vmem)] * 4,
        out_specs=pl.BlockSpec(memory_space=vmem),
    )(xf, params["w_conv"], params["w_fc"], params["bias"])
    return out[:n, :2]


# ----------------------------------------------------------------------------
# Parameter packing: all folding / layout work done once at init.
# ----------------------------------------------------------------------------
def _fold_pool_taps(w3):
    """(3, cin, cout) conv taps -> (4, cin, cout) taps of conv+avg_pool(1,2):
    0.5*[w0, w0+w1, w1+w2, w2] (the 0.5 pooling scale is folded in)."""
    z = jnp.zeros_like(w3[:1])
    return 0.5 * (jnp.concatenate([w3, z], axis=0) +
                  jnp.concatenate([z, w3], axis=0))


def pack_params(tw):
    f = jnp.float32

    # conv1+pool as one dense (48, 256) matrix.
    # Input row r = p*3 + cin over the 14 width-padded positions; output lane
    # l = (h*6 + j)*20 + c1.  With H_in=1 and pad=1, output row h uses kernel
    # row kh = 1 - h.
    w1d = jnp.zeros((14, 3, 2, 6, 20), f)                 # [p, cin, h, j, c1]
    for h in (0, 1):
        taps = _fold_pool_taps(
            jnp.transpose(tw["w_conv1"][:, :, 1 - h, :], (2, 1, 0)))  # (4,3,20)
        for j in range(6):
            for t in range(4):
                w1d = w1d.at[2 * j + t, :, h, j, :].set(taps[t])
    w1 = jnp.pad(w1d.reshape(42, 240), ((0, 6), (0, 16)))             # (48, 256)

    # conv2+pool as one dense (256, 256) matrix.
    # Row = conv1-activation lane (h'*6 + j1)*20 + c1; output lane
    # l = (h*2 + j2)*40 + c2.
    w2d = jnp.zeros((2, 6, 20, 2, 2, 40), f)              # [h', j1, c1, h, j2, c2]
    taps2 = _fold_pool_taps(
        jnp.transpose(tw["w_conv2"][:, :, 0, :], (2, 1, 0)))          # (4,20,40)
    for h in (0, 1):
        for j2 in range(2):
            for t in range(4):
                w2d = w2d.at[h, 2 * j2 + t, :, h, j2, :].set(taps2[t])
    w2 = jnp.pad(w2d.reshape(240, 160), ((0, 16), (0, 96)))           # (256, 256)

    w_conv = jnp.concatenate([w1, w2], axis=0)                        # (304, 256)

    # fc1 rows permuted from torch's NCHW flatten (c2*4 + h*2 + w) to the
    # kernel's (h, w)-major / channel-minor activation lane order.
    wf1 = jnp.transpose(tw["w_fc1"].reshape(100, 40, 2, 2),
                        (2, 3, 1, 0)).reshape(160, 100)
    wf1 = jnp.pad(wf1, ((0, 96), (0, 28)))                            # (256, 128)
    wf2 = jnp.pad(tw["w_fc2"].T, ((0, 28), (0, 78)))                  # (128, 128)
    wf3 = jnp.pad(tw["w_fc3"].T, ((0, 78), (0, 126)))                 # (128, 128)
    w_fc = jnp.concatenate([wf1, wf2, wf3], axis=0)                   # (512, 128)

    bias = jnp.stack([jnp.pad(tw["b_fc1"], (0, 28)),
                      jnp.pad(tw["b_fc2"], (0, 78)),
                      jnp.pad(tw["b_fc3"], (0, 126))], axis=0)        # (3, 128)
    bias = jnp.pad(bias, ((0, 5), (0, 0)))                            # (8, 128)

    return dict(w_conv=w_conv.astype(jnp.bfloat16),
                w_fc=w_fc.astype(jnp.bfloat16),
                bias=bias.astype(f))


def init_params(key):
    ks = jax.random.split(key, 8)
    tw = dict(
        w_conv1=0.1 * jax.random.normal(ks[0], (20, 3, 2, 3), jnp.float32),
        w_conv2=0.1 * jax.random.normal(ks[1], (40, 20, 1, 3), jnp.float32),
        w_fc1=0.1 * jax.random.normal(ks[2], (100, 160), jnp.float32),
        b_fc1=0.1 * jax.random.normal(ks[3], (100,), jnp.float32),
        w_fc2=0.1 * jax.random.normal(ks[4], (50, 100), jnp.float32),
        b_fc2=0.1 * jax.random.normal(ks[5], (50,), jnp.float32),
        w_fc3=0.1 * jax.random.normal(ks[6], (2, 50), jnp.float32),
        b_fc3=0.1 * jax.random.normal(ks[7], (2,), jnp.float32),
    )
    return pack_params(tw), tw


# Pure-JAX reference of the PyTorch forward (self-validation only).
def reference_forward(x, tw):
    def avg_pool_1x2(y):
        n, c, h, w = y.shape
        return y.reshape(n, c, h, w // 2, 2).mean(-1)

    dn = ("NCHW", "OIHW", "NCHW")
    y = lax.conv_general_dilated(x, tw["w_conv1"], (1, 1),
                                 [(1, 1), (1, 1)], dimension_numbers=dn)
    y = jnp.maximum(avg_pool_1x2(y), 0.0)
    y = lax.conv_general_dilated(y, tw["w_conv2"], (1, 1),
                                 [(0, 0), (0, 0)], dimension_numbers=dn)
    y = jnp.maximum(avg_pool_1x2(y), 0.0)
    y = y.reshape(y.shape[0], -1)
    y = jnp.maximum(y @ tw["w_fc1"].T + tw["b_fc1"], 0.0)
    y = jnp.maximum(y @ tw["w_fc2"].T + tw["b_fc2"], 0.0)
    return y @ tw["w_fc3"].T + tw["b_fc3"]


if __name__ == "__main__":
    # Input consistent with fc1's in_features=160: (N, 3, H=1, W=12)
    #   conv1+pad1 -> (N,20,2,12) -> pool -> (N,20,2,6)
    #   conv2      -> (N,40,2,4)  -> pool -> (N,40,2,2) -> flatten 160
    key = jax.random.PRNGKey(0)
    kx, kp = jax.random.split(key)
    x = jax.random.normal(kx, (2, 3, 1, 12), jnp.float32)
    params, torch_w = init_params(kp)

    fwd = jax.jit(net_forward)
    out = jax.block_until_ready(fwd(x, params))
    assert out.shape == (2, 2), out.shape

    ref = reference_forward(x, torch_w)
    # bf16 weights + bf16 dot inputs (f32 accumulate): slightly looser check.
    assert jnp.allclose(out, ref, atol=2e-2, rtol=2e-2), (out, ref)

    print("KERNEL_OK")
</pallas_src>

<mosaic_0001>
module attributes {stable_mosaic.version = 11 : i64} {
  func.func @_net_fused_kernel(%arg0: memref<8x48xf32, #tpu.memory_space<vmem>>, %arg1: memref<304x256xbf16, #tpu.memory_space<vmem>>, %arg2: memref<512x128xbf16, #tpu.memory_space<vmem>>, %arg3: memref<8x128xf32, #tpu.memory_space<vmem>>, %arg4: memref<8x128xf32, #tpu.memory_space<vmem>>) attributes {dimension_semantics = [], scalar_prefetch = 0 : i64, scratch_operands = 0 : i64, tpu.core_type = #tpu.core_type<tc>} {
    %c0 = arith.constant 0 : index
    %c0_0 = arith.constant 0 : index
    %0 = vector.load %arg0[%c0, %c0_0] : memref<8x48xf32, #tpu.memory_space<vmem>>, vector<8x48xf32>
    %c0_1 = arith.constant 0 : index
    %c0_2 = arith.constant 0 : index
    %1 = vector.load %arg1[%c0_1, %c0_2] : memref<304x256xbf16, #tpu.memory_space<vmem>>, vector<48x256xbf16>
    %c48 = arith.constant 48 : index
    %c0_3 = arith.constant 0 : index
    %2 = vector.load %arg1[%c48, %c0_3] : memref<304x256xbf16, #tpu.memory_space<vmem>>, vector<256x256xbf16>
    %c0_4 = arith.constant 0 : index
    %c0_5 = arith.constant 0 : index
    %3 = vector.load %arg2[%c0_4, %c0_5] : memref<512x128xbf16, #tpu.memory_space<vmem>>, vector<256x128xbf16>
    %c256 = arith.constant 256 : index
    %c0_6 = arith.constant 0 : index
    %4 = vector.load %arg2[%c256, %c0_6] : memref<512x128xbf16, #tpu.memory_space<vmem>>, vector<128x128xbf16>
    %c384 = arith.constant 384 : index
    %c0_7 = arith.constant 0 : index
    %5 = vector.load %arg2[%c384, %c0_7] : memref<512x128xbf16, #tpu.memory_space<vmem>>, vector<128x128xbf16>
    %c0_8 = arith.constant 0 : index
    %c0_9 = arith.constant 0 : index
    %6 = vector.load %arg3[%c0_8, %c0_9] : memref<8x128xf32, #tpu.memory_space<vmem>>, vector<8x128xf32>
    %7 = arith.truncf %0 : vector<8x48xf32> to vector<8x48xbf16>
    %cst = arith.constant dense<0.000000e+00> : vector<8x256xf32>
    %8 = tpu.matmul %7, %1, %cst {dimension_numbers = #tpu.dot_dimension_numbers<[1], [0], [0], [1], [0, 0, 1, 1], [], []>} : vector<8x48xbf16>, vector<48x256xbf16>, vector<8x256xf32> -> vector<8x256xf32>
    %cst_10 = arith.constant 0.000000e+00 : f32
    %9 = vector.broadcast %cst_10 : f32 to vector<8x256xf32>
    %10 = arith.maximumf %8, %9 : vector<8x256xf32>
    %11 = arith.truncf %10 : vector<8x256xf32> to vector<8x256xbf16>
    %cst_11 = arith.constant dense<0.000000e+00> : vector<8x256xf32>
    %12 = tpu.matmul %11, %2, %cst_11 {dimension_numbers = #tpu.dot_dimension_numbers<[1], [0], [0], [1], [0, 0, 1, 1], [], []>} : vector<8x256xbf16>, vector<256x256xbf16>, vector<8x256xf32> -> vector<8x256xf32>
    %cst_12 = arith.constant 0.000000e+00 : f32
    %13 = vector.broadcast %cst_12 : f32 to vector<8x256xf32>
    %14 = arith.maximumf %12, %13 : vector<8x256xf32>
    %15 = arith.truncf %14 : vector<8x256xf32> to vector<8x256xbf16>
    %cst_13 = arith.constant dense<0.000000e+00> : vector<8x128xf32>
    %16 = tpu.matmul %15, %3, %cst_13 {dimension_numbers = #tpu.dot_dimension_numbers<[1], [0], [0], [1], [0, 0, 1, 1], [], []>} : vector<8x256xbf16>, vector<256x128xbf16>, vector<8x128xf32> -> vector<8x128xf32>
    %17 = vector.extract_strided_slice %6 {offsets = [0, 0], sizes = [1, 128], strides = [1, 1]} : vector<8x128xf32> to vector<1x128xf32>
    %18 = vector.broadcast %17 : vector<1x128xf32> to vector<8x128xf32>
    %19 = arith.addf %16, %18 : vector<8x128xf32>
    %cst_14 = arith.constant 0.000000e+00 : f32
    %20 = vector.broadcast %cst_14 : f32 to vector<8x128xf32>
    %21 = arith.maximumf %19, %20 : vector<8x128xf32>
    %22 = arith.truncf %21 : vector<8x128xf32> to vector<8x128xbf16>
    %cst_15 = arith.constant dense<0.000000e+00> : vector<8x128xf32>
    %23 = tpu.matmul %22, %4, %cst_15 {dimension_numbers = #tpu.dot_dimension_numbers<[1], [0], [0], [1], [0, 0, 1, 1], [], []>} : vector<8x128xbf16>, vector<128x128xbf16>, vector<8x128xf32> -> vector<8x128xf32>
    %24 = vector.extract_strided_slice %6 {offsets = [1, 0], sizes = [1, 128], strides = [1, 1]} : vector<8x128xf32> to vector<1x128xf32>
    %25 = vector.broadcast %24 : vector<1x128xf32> to vector<8x128xf32>
    %26 = arith.addf %23, %25 : vector<8x128xf32>
    %cst_16 = arith.constant 0.000000e+00 : f32
    %27 = vector.broadcast %cst_16 : f32 to vector<8x128xf32>
    %28 = arith.maximumf %26, %27 : vector<8x128xf32>
    %29 = arith.truncf %28 : vector<8x128xf32> to vector<8x128xbf16>
    %cst_17 = arith.constant dense<0.000000e+00> : vector<8x128xf32>
    %30 = tpu.matmul %29, %5, %cst_17 {dimension_numbers = #tpu.dot_dimension_numbers<[1], [0], [0], [1], [0, 0, 1, 1], [], []>} : vector<8x128xbf16>, vector<128x128xbf16>, vector<8x128xf32> -> vector<8x128xf32>
    %31 = vector.extract_strided_slice %6 {offsets = [2, 0], sizes = [1, 128], strides = [1, 1]} : vector<8x128xf32> to vector<1x128xf32>
    %32 = vector.broadcast %31 : vector<1x128xf32> to vector<8x128xf32>
    %33 = arith.addf %30, %32 : vector<8x128xf32>
    %c0_18 = arith.constant 0 : index
    %c0_19 = arith.constant 0 : index
    %34 = vector.load %arg4[%c0_18, %c0_19] : memref<8x128xf32, #tpu.memory_space<vmem>>, vector<8x128xf32>
    tpu.vector_store %arg4[%c0_18, %c0_19], %33 {strides = array<i32>} : memref<8x128xf32, #tpu.memory_space<vmem>>, vector<8x128xf32>,
    return
  }
}

</mosaic_0001>

<bundles_post_ra>
// kernel: net_forward.1
= control target key start
LH: loop header
LB: loop body
LE: loop exit
PB: predicated region body
PF: predicated region fallthrough
CT: control target
= control target key end

     0   :  { %9 = vsyncpa [#allocation3], 0  ;;  %s1152_s0 = inlined_call_operand.vmem [shape: f32[8,48], index: 0, kind: input, shape index: {}]   ;;  %s1153_s1 = inlined_call_operand.hbm [shape: bf16[304,256], index: 1, kind: input, shape index: {}]   ;;  %s1154_s2 = inlined_call_operand.hbm [shape: bf16[512,128], index: 2, kind: input, shape index: {}]   ;;  %s1155_s3 = inlined_call_operand.vmem [shape: f32[8,128], index: 3, kind: input, shape index: {}]   ;;  %s1156_s4 = inlined_call_operand.vmem [shape: f32[8,128], index: 4, kind: output, shape index: {}]  }
   0x1   :  { %10 = vsyncpa [#allocation5], 0  ;;  %s1067_s15 = smov [#allocation2]   ;;  %s1019_s19 = scalar_lea.hbm %s1153_s1, 4864 }
   0x2   :  { %s18_s16 = sshll.u32 %s1067_s15, 4  ;;  %p1020_p0 = scmp.ne.s32.totalorder %s1153_s1, %s1019_s19  ;;  %s19_s16 = int_to_ptr.vmem [resolvable:$true] %s18_s16 }
   0x3   :  { %p1023_p1 = scmp.lt.u32.totalorder %s1019_s19, %s1153_s1 }
   0x5   :  { %p1025_p2 = pnand %p1023_p1, %p1020_p0 }
   0x7   :  { %1028 = shalt.err (!%p1025_p2)
}
   0x8   :  { %s1029_s24 = scalar_lea.vmem %s19_s16, 4864  ;;  %p1034_p4 = scmp.lt.s32.totalorder %s19_s16, %s19_s16 }
   0x9   :  { %p1030_p3 = scmp.ne.s32.totalorder %s19_s16, %s1029_s24  ;;  %p1035_p5 = scmp.lt.s32.totalorder %s1029_s24, %s1029_s24 }
   0xb   :  { %p1036_p6 = por %p1035_p5, %p1034_p4 }
   0xd   :  { %p1037_p7 = pnand %p1036_p6, %p1030_p3 }
   0xf   :  { %1040 = shalt.err (!%p1037_p7)
}
  0x10   :  { %s1068_s25 = smov 128   ;;  %s1069_s26 = smov 8  }
  0x11   :  { %24 = dma.hbm_to_vmem [thread:$0]  %s1153_s1, 4864, %s19_s16, [#allocation3], %s1068_s25, %s1068_s25, %s1069_s26  }
  0x12   :  { %s1070_s29 = smov [#allocation4]   ;;  %s1041_s7 = scalar_lea.hbm %s1154_s2, 4096 }
  0x13   :  { %s30_s30 = sshll.u32 %s1070_s29, 4  ;;  %p1042_p8 = scmp.ne.s32.totalorder %s1154_s2, %s1041_s7  ;;  %s31_s30 = int_to_ptr.vmem [resolvable:$true] %s30_s30 }
  0x14   :  { %p1045_p9 = scmp.lt.u32.totalorder %s1041_s7, %s1154_s2 }
  0x16   :  { %p1047_p10 = pnand %p1045_p9, %p1042_p8 }
  0x18   :  { %1050 = shalt.err (!%p1047_p10)
}
  0x19   :  { %s1051_s12 = scalar_lea.vmem %s31_s30, 4096  ;;  %p1056_p12 = scmp.lt.s32.totalorder %s31_s30, %s31_s30 }
  0x1a   :  { %p1052_p11 = scmp.ne.s32.totalorder %s31_s30, %s1051_s12  ;;  %p1057_p13 = scmp.lt.s32.totalorder %s1051_s12, %s1051_s12 }
  0x1c   :  { %p1058_p0 = por %p1057_p13, %p1056_p12 }
  0x1e   :  { %p1059_p1 = pnand %p1058_p0, %p1052_p11 }
  0x20   :  { %1062 = shalt.err (!%p1059_p1)
}
  0x21   :  { %s1071_s1 = smov 64   ;;  %s1072_s13 = smov 4  }
  0x22   :  { %36 = dma.hbm_to_vmem [thread:$0]  %s1154_s2, 4096, %s31_s30, [#allocation5], %s1071_s1, %s1071_s1, %s1072_s13  }
  0x23   :  { %1063 = dma.done.wait [#allocation3], 4864  }
  0x24   :  { %1064 = vsyncadd [#allocation3], 4294962432 }
  0x25   :  { %1065 = dma.done.wait [#allocation5], 4096  }
  0x26   :  { %1066 = vsyncadd [#allocation5], 4294963200  ;;  %v1073_v0 = vmov 0   ;;  %v930_v1 = vld [vmem:[#allocation2 + $0x4] ss:$8 sps:$4 sm:$0xff]   ;;  %vm181_vm0 = vcmask 392192  }
  0x27   :  { %217 = vmatprep.mubr.bf16.mxu0 %v1073_v0  ;;  %v932_v2 = vld [vmem:[#allocation2] ss:$8 sps:$4 sm:$0xff]   ;;  %185 = vmatprep.subr.bf16.mxu0 %v930_v1  ;;  %v933_v3 = vld [vmem:[#allocation2 + $0x14] ss:$8 sps:$4 sm:$0xff]   ;;  %v935_v4 = vld [vmem:[#allocation2 + $0x10] ss:$8 sps:$4 sm:$0xff]  }
  0x28   :  { %186 = vmatpush1.bf16.msra.mxu0 %v932_v2  ;;  %v936_v5 = vld [vmem:[#allocation2 + $0x24] ss:$8 sps:$4 sm:$0xff]   ;;  %v939_v6 = vld [vmem:[#allocation2 + $0x34] ss:$8 sps:$4 sm:$0xff]   ;;  %v941_v7 = vld [vmem:[#allocation2 + $0x30] ss:$8 sps:$4 sm:$0xff]  }
  0x29   :  { %187 = vmatprep.subr.bf16.mxu0 %v933_v3  ;;  %v938_v8 = vld [vmem:[#allocation2 + $0x20] ss:$8 sps:$4 sm:$0xff]   ;;  %v942_v9 = vld [vmem:[#allocation2 + $0x44] ss:$8 sps:$4 sm:$0xff]   ;;  %390 = vmatprep.subr.bf16.mxu1 %v939_v6  ;;  %v945_v12 = vld [vmem:[#allocation2 + $0x54] ss:$8 sps:$4 sm:$0xff]  }
  0x2a   :  { %v46_v10 = vld [vmem:[%s1152_s0] sm:$0xff]  ;;  %391 = vmatpush1.bf16.msra.mxu1 %v941_v7  ;;  %v947_v14 = vld [vmem:[#allocation2 + $0x50] ss:$8 sps:$4 sm:$0xff]   ;;  %v951_v17 = vld [vmem:[#allocation2 + $0x74] ss:$8 sps:$4 sm:$0xff]   ;;  %v1074_v1 = vmov 0.0  }
  0x2b   :  { %v944_v11 = vld [vmem:[#allocation2 + $0x40] ss:$8 sps:$4 sm:$0xff]   ;;  %392 = vmatprep.subr.bf16.mxu1 %v942_v9  ;;  %v150_v13 = vpack.c.bf16 %v46_v10, %v46_v10  ;;  %v948_v15 = vld [vmem:[#allocation2 + $0x64] ss:$8 sps:$4 sm:$0xff]   ;;  %v953_v18 = vld [vmem:[#allocation2 + $0x70] ss:$8 sps:$4 sm:$0xff]  }
  0x2c   :  { %188 = vmatpush1.bf16.msra.mxu0 %v935_v4  ;;  %v950_v16 = vld [vmem:[#allocation2 + $0x60] ss:$8 sps:$4 sm:$0xff]   ;;  %v954_v19 = vld [vmem:[#allocation2 + $0x84] ss:$8 sps:$4 sm:$0xff]   ;;  %v957_v21 = vld [vmem:[#allocation2 + $0x94] ss:$8 sps:$4 sm:$0xff]  }
  0x2d   :  { %189 = vmatprep.subr.bf16.mxu0 %v936_v5  ;;  %v956_v20 = vld [vmem:[#allocation2 + $0x80] ss:$8 sps:$4 sm:$0xff]   ;;  %v959_v22 = vld [vmem:[#allocation2 + $0x90] ss:$8 sps:$4 sm:$0xff]   ;;  %v960_v23 = vld [vmem:[#allocation2 + $0xa4] ss:$8 sps:$4 sm:$0xff]  }
  0x2e   :  { %393 = vmatpush1.bf16.msra.mxu1 %v944_v11  ;;  %v962_v24 = vld [vmem:[#allocation2 + $0xa0] ss:$8 sps:$4 sm:$0xff]   ;;  %v963_v25 = vld [vmem:[#allocation2 + $0xb4] ss:$8 sps:$4 sm:$0xff]   ;;  %v965_v26 = vld [vmem:[#allocation2 + $0xb0] ss:$8 sps:$4 sm:$0xff]  }
  0x2f   :  { %394 = vmatprep.subr.bf16.mxu1 %v945_v12  ;;  %v966_v27 = vld [vmem:[#allocation2 + $0xc4] ss:$8 sps:$4 sm:$0xff]   ;;  %v968_v28 = vld [vmem:[#allocation2 + $0xc0] ss:$8 sps:$4 sm:$0xff]   ;;  %v969_v29 = vld [vmem:[#allocation2 + $0xd4] ss:$8 sps:$4 sm:$0xff]  }
  0x30   :  { %190 = vmatpush1.bf16.msra.mxu0 %v938_v8  ;;  %v971_v30 = vld [vmem:[#allocation2 + $0xd0] ss:$8 sps:$4 sm:$0xff]   ;;  %v972_v31 = vld [vmem:[#allocation2 + $0xe4] ss:$8 sps:$4 sm:$0xff]   ;;  %v974_v32 = vld [vmem:[#allocation2 + $0xe0] ss:$8 sps:$4 sm:$0xff]  }
  0x31   :  { %v975_v33 = vld [vmem:[#allocation2 + $0xf4] ss:$8 sps:$4 sm:$0xff]   ;;  %v977_v34 = vld [vmem:[#allocation2 + $0xf0] ss:$8 sps:$4 sm:$0xff]   ;;  %v978_v35 = vld [vmem:[#allocation2 + $0x104] ss:$8 sps:$4 sm:$0xff]  }
  0x32   :  { %395 = vmatpush1.bf16.msra.mxu1 %v947_v14  ;;  %v980_v36 = vld [vmem:[#allocation2 + $0x100] ss:$8 sps:$4 sm:$0xff]   ;;  %v981_v37 = vld [vmem:[#allocation2 + $0x114] ss:$8 sps:$4 sm:$0xff]   ;;  %v983_v38 = vld [vmem:[#allocation2 + $0x110] ss:$8 sps:$4 sm:$0xff]  }
  0x33   :  { %776 = vmatmul.mubr.msk.bf16.vlgmr.msra.gmra.mrb[0].mxu0 %vm181_vm0, %v150_v13  ;;  %396 = vmatprep.subr.bf16.mxu1 %v948_v15  ;;  %v984_v39 = vld [vmem:[#allocation2 + $0x124] ss:$8 sps:$4 sm:$0xff]   ;;  %v986_v40 = vld [vmem:[#allocation2 + $0x120] ss:$8 sps:$4 sm:$0xff]   ;;  %v987_v41 = vld [vmem:[#allocation4 + $0x40] sm:$0xff]   ;;  %vm1075_vm1 = vmmov 0  }
  0x34   :  { %v988_v42 = vld [vmem:[#allocation4] sm:$0xff]   ;;  %v989_v43 = vld [vmem:[#allocation4 + $0x48] sm:$0xff]   ;;  %841 = vmatprep.subr.bf16.mxu0 %v987_v41  ;;  %v991_v45 = vld [vmem:[#allocation4 + $0x50] sm:$0xff]  }
  0x35   :  { %842 = vmatpush3.bf16.msra.mxu0 %v988_v42  ;;  %v990_v44 = vld [vmem:[#allocation4 + $0x8] sm:$0xff]   ;;  %v992_v46 = vld [vmem:[#allocation4 + $0x10] sm:$0xff]   ;;  %v993_v47 = vld [vmem:[#allocation4 + $0x58] sm:$0xff]  }
  0x36   :  { %397 = vmatpush1.bf16.msra.mxu1 %v950_v16  ;;  %843 = vmatprep.subr.bf16.mxu0 %v989_v43  ;;  %v994_v48 = vld [vmem:[#allocation4 + $0x18] sm:$0xff]   ;;  %v995_v49 = vld [vmem:[#allocation4 + $0x60] sm:$0xff]   ;;  %v997_v51 = vld [vmem:[#allocation4 + $0x68] sm:$0xff]  }
  0x37   :  { %398 = vmatprep.subr.bf16.mxu1 %v951_v17  ;;  %v996_v50 = vld [vmem:[#allocation4 + $0x20] sm:$0xff]   ;;  %v998_v52 = vld [vmem:[#allocation4 + $0x28] sm:$0xff]   ;;  %v999_v53 = vld [vmem:[#allocation4 + $0x70] sm:$0xff]  }
  0x38   :  { %v1000_v62 = vld [vmem:[#allocation4 + $0x30] sm:$0xff]   ;;  %v1001_v63 = vld [vmem:[#allocation4 + $0x78] sm:$0xff]   ;;  %v1003_v9 = vld [vmem:[#allocation4 + $0x80] sm:$0xff]  }
  0x39   :  { %844 = vmatpush3.bf16.msra.mxu0 %v990_v44  ;;  %v1002_v0 = vld [vmem:[#allocation4 + $0x38] sm:$0xff]   ;;  %v1004_v11 = vld [vmem:[#allocation4 + $0x88] sm:$0xff]   ;;  %v1005_v12 = vld [vmem:[#allocation4 + $0x90] sm:$0xff]  }
  0x3a   :  { %399 = vmatpush1.bf16.msra.mxu1 %v953_v18  ;;  %845 = vmatprep.subr.bf16.mxu0 %v991_v45  ;;  %v1006_v13 = vld [vmem:[#allocation4 + $0x98] sm:$0xff]   ;;  %v1007_v14 = vld [vmem:[#allocation4 + $0xa0] sm:$0xff]   ;;  %v1008_v15 = vld [vmem:[#allocation4 + $0xa8] sm:$0xff]  }
  0x3b   :  { %400 = vmatprep.subr.bf16.mxu1 %v954_v19  ;;  %v1009_v16 = vld [vmem:[#allocation4 + $0xb0] sm:$0xff]   ;;  %v1010_v17 = vld [vmem:[#allocation4 + $0xb8] sm:$0xff]   ;;  %v1011_v18 = vld [vmem:[#allocation4 + $0xc0] sm:$0xff]  }
  0x3c   :  { %v1012_v19 = vld [vmem:[#allocation4 + $0xc8] sm:$0xff]  }
  0x3d   :  { %846 = vmatpush3.bf16.msra.mxu0 %v992_v46 }
  0x3e   :  { %401 = vmatpush1.bf16.msra.mxu1 %v956_v20  ;;  %847 = vmatprep.subr.bf16.mxu0 %v993_v47  ;;  %v1013_v20 = vld [vmem:[#allocation4 + $0xd0] sm:$0xff]  }
  0x3f   :  { %402 = vmatprep.subr.bf16.mxu1 %v957_v21  ;;  %v1014_v21 = vld [vmem:[#allocation4 + $0xd8] sm:$0xff]  }
  0x41   :  { %848 = vmatpush3.bf16.msra.mxu0 %v994_v48 }
  0x42   :  { %403 = vmatpush1.bf16.msra.mxu1 %v959_v22  ;;  %849 = vmatprep.subr.bf16.mxu0 %v995_v49  ;;  %v1015_v22 = vld [vmem:[#allocation4 + $0xe0] sm:$0xff]  }
  0x43   :  { %404 = vmatprep.subr.bf16.mxu1 %v960_v23  ;;  %v1016_v23 = vld [vmem:[#allocation4 + $0xe8] sm:$0xff]  }
  0x45   :  { %850 = vmatpush3.bf16.msra.mxu0 %v996_v50 }
  0x46   :  { %405 = vmatpush1.bf16.msra.mxu1 %v962_v24  ;;  %851 = vmatprep.subr.bf16.mxu0 %v997_v51  ;;  %v435_v24 = vlaneseq }
  0x47   :  { %406 = vmatprep.subr.bf16.mxu1 %v963_v25 }
  0x48   :  { %v436_v25 = vshrl.u32 %v435_v24, 7 }
  0x49   :  { %852 = vmatpush3.bf16.msra.mxu0 %v998_v52 }
  0x4a   :  { %407 = vmatpush1.bf16.msra.mxu1 %v965_v26  ;;  %853 = vmatprep.subr.bf16.mxu0 %v999_v53  ;;  %v437_v26 = vsub.s32 0, %v436_v25  ;;  %v673_v48 = vsub.s32 2, %v436_v25 }
  0x4b   :  { %408 = vmatprep.subr.bf16.mxu1 %v966_v27  ;;  %v149_v27 = vld [vmem:[%s1155_s3] sm:$0xff] }
  0x4c   :  { %v674_v49 = vrot.slane %v149_v27, %v673_v48 }
  0x4d   :  { %854 = vmatpush3.bf16.msra.mxu0 %v1000_v62 }
  0x4e   :  { %409 = vmatpush1.bf16.msra.mxu1 %v968_v28  ;;  %855 = vmatprep.subr.bf16.mxu0 %v1001_v63 }
  0x4f   :  { %410 = vmatprep.subr.bf16.mxu1 %v969_v29  ;;  %v438_v29 = vrot.slane %v149_v27, %v437_v26 }
  0x51   :  { %856 = vmatpush3.bf16.msra.mxu0 %v1002_v0 }
  0x52   :  { %411 = vmatpush1.bf16.msra.mxu1 %v971_v30  ;;  %881 = vmatprep.subr.bf16.mxu0 %v1074_v1 }
  0x53   :  { %412 = vmatprep.subr.bf16.mxu1 %v972_v31 }
  0x56   :  { %413 = vmatpush1.bf16.msra.mxu1 %v974_v32 }
  0x57   :  { %414 = vmatprep.subr.bf16.mxu1 %v975_v33 }
  0x5a   :  { %415 = vmatpush1.bf16.msra.mxu1 %v977_v34 }
  0x5b   :  { %416 = vmatprep.subr.bf16.mxu1 %v978_v35 }
  0x5e   :  { %417 = vmatpush1.bf16.msra.mxu1 %v980_v36 }
  0x5f   :  { %418 = vmatprep.subr.bf16.mxu1 %v981_v37  ;;  %v1017_v37 = vld [vmem:[#allocation4 + $0xf0] sm:$0xff]  }
  0x62   :  { %419 = vmatpush1.bf16.msra.mxu1 %v983_v38  ;;  %v1018_v38 = vld [vmem:[#allocation4 + $0xf8] sm:$0xff]  }
  0x63   :  { %420 = vmatprep.subr.bf16.mxu1 %v984_v39  ;;  %v579_v39 = vsub.s32 1, %v436_v25 }
  0x66   :  { %421 = vmatpush1.bf16.msra.mxu1 %v986_v40  ;;  %v580_v40 = vrot.slane %v149_v27, %v579_v39 }
  0x67   :  { %901 = vmatprep.subr.bf16.mxu1 %v1074_v1 }
 0x106   :  { %v219_v54 = vpop.f32.mrb[0].mxu0 }
 0x107   :  { %v226_v55 = vmax.f32 %v219_v54, 0.0  ;;  %v221_v56 = vpop.f32.mrb[1].mxu0 }
 0x108   :  { %v223_v57 = vpop.f32.mrb[2].mxu0  ;;  %v227_v58 = vmax.f32 %v221_v56, 0.0 }
 0x109   :  { %v224_v59 = vpop.f32.mrb[3].mxu0  ;;  %v228_v61 = vpack.c.bf16 %v226_v55, %v226_v55 }
 0x10a   :  { %v229_v60 = vpack.c.bf16 %v227_v58, %v227_v58 }
 0x10c   :  { %422 = vmatprep.mubr.bf16.mxu1 %v229_v60 }
 0x10d   :  { %423 = vmatmul.mubr.bf16.vlgmr.msra.gmra.mrb[0].mxu1 %v228_v61 }
 0x10e   :  { %917 = vmatprep.mubr.msk.bf16.mxu1 %vm1075_vm1, %v1074_v1  ;;  %902 = vmatpush3.bf16.msra.mxu1 %v1011_v18 }
 0x10f   :  { %903 = vmatprep.subr.bf16.mxu1 %v1074_v1 }
 0x112   :  { %904 = vmatpush3.bf16.msra.mxu1 %v1012_v19 }
 0x113   :  { %905 = vmatprep.subr.bf16.mxu1 %v1074_v1 }
 0x116   :  { %906 = vmatpush3.bf16.msra.mxu1 %v1013_v20 }
 0x117   :  { %907 = vmatprep.subr.bf16.mxu1 %v1074_v1 }
 0x11a   :  { %908 = vmatpush3.bf16.msra.mxu1 %v1014_v21 }
 0x11b   :  { %909 = vmatprep.subr.bf16.mxu1 %v1074_v1 }
 0x11e   :  { %910 = vmatpush3.bf16.msra.mxu1 %v1015_v22 }
 0x11f   :  { %911 = vmatprep.subr.bf16.mxu1 %v1074_v1 }
 0x122   :  { %912 = vmatpush3.bf16.msra.mxu1 %v1016_v23 }
 0x123   :  { %913 = vmatprep.subr.bf16.mxu1 %v1074_v1 }
 0x126   :  { %914 = vmatpush3.bf16.msra.mxu1 %v1017_v37 }
 0x127   :  { %915 = vmatprep.subr.bf16.mxu1 %v1074_v1 }
 0x12a   :  { %916 = vmatpush3.bf16.msra.mxu1 %v1018_v38 }
 0x1e0   :  { %v424_v2 = vpop.f32.mrb[0].mxu1 }
 0x1e1   :  { %v431_v3 = vmax.f32 %v424_v2, 0.0  ;;  %v426_v4 = vpop.f32.mrb[1].mxu1 }
 0x1e2   :  { %v432_v5 = vmax.f32 %v426_v4, 0.0  ;;  %v428_v6 = vpop.f32.mrb[2].mxu1 }
 0x1e3   :  { %v429_v7 = vpop.f32.mrb[3].mxu1  ;;  %v433_v10 = vpack.c.bf16 %v431_v3, %v431_v3 }
 0x1e4   :  { %v434_v8 = vpack.c.bf16 %v432_v5, %v432_v5 }
 0x1e6   :  { %567 = vmatprep.mubr.bf16.mxu0 %v434_v8 }
 0x1e7   :  { %568 = vmatmul.mubr.bf16.vlgmr.msra.gmra.mrb[4].mxu0 %v433_v10 }
 0x1e8   :  { %882 = vmatpush3.bf16.msra.mxu0 %v1003_v9  ;;  %897 = vmatprep.mubr.msk.bf16.mxu0 %vm1075_vm1, %v1074_v1 }
 0x1e9   :  { %883 = vmatprep.subr.bf16.mxu0 %v1074_v1 }
 0x1ec   :  { %884 = vmatpush3.bf16.msra.mxu0 %v1004_v11 }
 0x1ed   :  { %885 = vmatprep.subr.bf16.mxu0 %v1074_v1 }
 0x1f0   :  { %886 = vmatpush3.bf16.msra.mxu0 %v1005_v12 }
 0x1f1   :  { %887 = vmatprep.subr.bf16.mxu0 %v1074_v1 }
 0x1f4   :  { %888 = vmatpush3.bf16.msra.mxu0 %v1006_v13 }
 0x1f5   :  { %889 = vmatprep.subr.bf16.mxu0 %v1074_v1 }
 0x1f8   :  { %890 = vmatpush3.bf16.msra.mxu0 %v1007_v14 }
 0x1f9   :  { %891 = vmatprep.subr.bf16.mxu0 %v1074_v1 }
 0x1fc   :  { %892 = vmatpush3.bf16.msra.mxu0 %v1008_v15 }
 0x1fd   :  { %893 = vmatprep.subr.bf16.mxu0 %v1074_v1 }
 0x200   :  { %894 = vmatpush3.bf16.msra.mxu0 %v1009_v16 }
 0x201   :  { %895 = vmatprep.subr.bf16.mxu0 %v1074_v1 }
 0x204   :  { %896 = vmatpush3.bf16.msra.mxu0 %v1010_v17 }
 0x2ba   :  { %v857_v28 = vpop.f32.mrb[4].mxu0 }
 0x2bb   :  { %v858_v30 = vpop.f32.mrb[5].mxu0 }
 0x2bc   :  { %v859_v31 = vadd.f32 %v858_v30, %v857_v28  ;;  %v860_v32 = vpop.f32.mrb[6].mxu0 }
 0x2bd   :  { %v861_v33 = vpop.f32.mrb[7].mxu0 }
 0x2be   :  { %v570_v34 = vadd.f32 %v859_v31, %v438_v29 }
 0x2c0   :  { %v575_v35 = vmax.f32 %v570_v34, 0.0 }
 0x2c2   :  { %v576_v36 = vpack.c.bf16 %v575_v35, %v575_v35 }
 0x2c4   :  { %898 = vmatmul.mubr.bf16.vlgmr.msra.gmra.mrb[8].mxu0 %v576_v36 }
 0x397   :  { %v663_v41 = vpop.f32.mrb[8].mxu0 }
 0x398   :  { %v664_v42 = vadd.f32 %v663_v41, %v580_v40  ;;  %v899_v43 = vpop.f32.mrb[9].mxu0 }
 0x399   :  { %v666_v44 = vpop.f32.mrb[10].mxu0 }
 0x39a   :  { %v669_v45 = vmax.f32 %v664_v42, 0.0  ;;  %v900_v46 = vpop.f32.mrb[11].mxu0 }
 0x39c   :  { %v670_v47 = vpack.c.bf16 %v669_v45, %v669_v45 }
 0x39e   :  { %918 = vmatmul.mubr.bf16.vlgmr.msra.gmra.mrb[4].mxu1 %v670_v47 }
 0x471   :  { %v757_v50 = vpop.f32.mrb[4].mxu1 }
 0x472   :  { %v758_v51 = vadd.f32 %v757_v50, %v674_v49  ;;  %v919_v52 = vpop.f32.mrb[5].mxu1 }
 0x473   :  { %v760_v53 = vpop.f32.mrb[6].mxu1 }
 0x474   :  { %763 = vst [vmem:[%s1156_s4] sm:$0xff] %v758_v51  ;;  %v920_v54 = vpop.f32.mrb[7].mxu1 }
 0x475   :  { %768 = vsyncpa [#allocation3], 1 }
 0x476   :  { %769 = vsyncpa [#allocation5], 1 }

</bundles_post_ra>
